<compile_context>
chip_gen: v7x
topology: tpu7x:2x2x1
jax: 0.10.0
libtpu: 0.0.40
codegen_flags: <defaults>
</compile_context>

<pallas_src>
import jax
import jax.numpy as jnp
from jax.experimental import pallas as pl
from jax.experimental.pallas import tpu as pltpu


def _pick_seq_tile(S, H, budget_bytes=4 << 20):
    """Largest multiple-of-8 divisor of S whose bf16 (tS, H) tile fits budget.

    Budget (~4 MiB per buffer) leaves double-buffering headroom within the
    32 MiB scoped VMEM of v6e/v7x (v7x has only 64 MiB physical VMEM per TC).
    """
    if S * H * 2 <= budget_bytes:
        return S
    cands = [t for t in range(8, S, 8) if S % t == 0 and t * H * 2 <= budget_bytes]
    return max(cands) if cands else S


def _fused_kernel(x_ref, m_ref, w_ref, b_ref, lw_ref, lb_ref, y_ref,
                  logits_ref, loss_ref, acc_ref, msum_ref, lsum_ref):
    b = pl.program_id(0)          # batch row
    k = pl.program_id(1)          # sequence tile (reduction axis, innermost)
    nb = pl.num_programs(0)
    nk = pl.num_programs(1)

    # global init: zero the loss accumulator once.
    @pl.when(jnp.logical_and(b == 0, k == 0))
    def _():
        lsum_ref[...] = jnp.zeros_like(lsum_ref)

    # per-batch init: zero the masked-sum / mask-sum accumulators.
    @pl.when(k == 0)
    def _():
        acc_ref[...] = jnp.zeros_like(acc_ref)
        msum_ref[...] = jnp.zeros_like(msum_ref)

    # Synthetic encoder projection on this (tS, H) tile:
    # bf16 MXU matmul with f32 accumulation, f32 bias + tanh (EUP).
    h = jnp.tanh(
        jnp.dot(x_ref[...], w_ref[...], preferred_element_type=jnp.float32)
        + b_ref[...])                                        # [tS, H] f32

    # dropout(p=0.1) in eval mode == identity.
    m = m_ref[...]                                           # [tS, 1] f32
    acc_ref[...] += jnp.sum(h * m, axis=0, keepdims=True)    # [1, H]
    msum_ref[...] += jnp.sum(m, axis=0, keepdims=True)       # [1, 1]

    # per-batch finalize: masked mean -> linear head -> logits + BCE term.
    @pl.when(k == nk - 1)
    def _():
        pooled = acc_ref[...] / msum_ref[...]                # [1, H] masked mean
        # H -> 1 head as a VPU multiply + lane reduce (an N=1 MXU matmul would
        # waste 127/255 of the systolic array and emit lane-1 masked stores).
        z = jnp.sum(pooled * lw_ref[...], axis=-1, keepdims=True) + lb_ref[0, 0]
        logits_ref[pl.ds(b, 1), :] = z                       # write row b
        y = y_ref[b]                                         # scalar label (SMEM)
        lsum_ref[...] += (jnp.maximum(z, 0.0) - z * y
                          + jnp.log1p(jnp.exp(-jnp.abs(z))))

    # global finalize: mean over the batch.
    @pl.when(jnp.logical_and(b == nb - 1, k == nk - 1))
    def _():
        loss_ref[...] = lsum_ref[...] / nb


def concat_bert_forward(params, input_ids, attention_mask, labels):
    B, S = input_ids.shape
    H = params["emb"].shape[1]

    # Synthetic "base": embedding lookup (XLA glue); cast to bf16 for the MXU
    # (halves HBM traffic into the kernel; elementwise math stays f32).
    emb = jnp.take(params["emb"], input_ids, axis=0).astype(jnp.bfloat16)  # [B,S,H]
    # Pre-shape the mask to [B, S, 1] so the kernel does no in-kernel relayout.
    mask3 = attention_mask.astype(jnp.float32)[:, :, None]                 # [B,S,1]
    labels1d = labels.reshape(B).astype(jnp.float32)                       # [B]

    tS = _pick_seq_tile(S, H)
    assert S % tS == 0
    grid = (B, S // tS)

    logits, loss = pl.pallas_call(
        _fused_kernel,
        out_shape=(
            jax.ShapeDtypeStruct((B, 1), jnp.float32),   # logits
            jax.ShapeDtypeStruct((1, 1), jnp.float32),   # loss
        ),
        grid_spec=pltpu.PrefetchScalarGridSpec(
            num_scalar_prefetch=0,
            grid=grid,
            in_specs=[
                # embedding tile, batch dim squeezed: kernel sees [tS, H] bf16
                pl.BlockSpec((None, tS, H), lambda b, k: (b, k, 0)),
                # mask tile: kernel sees [tS, 1] f32
                pl.BlockSpec((None, tS, 1), lambda b, k: (b, k, 0)),
                # encoder weight / bias: VMEM-resident (constant block index,
                # DMA'd once)
                pl.BlockSpec((H, H), lambda b, k: (0, 0)),
                pl.BlockSpec((1, H), lambda b, k: (0, 0)),
                # head weight [1, H] (torch nn.Linear(H, 1).weight layout)
                pl.BlockSpec((1, H), lambda b, k: (0, 0)),
                # head bias: SMEM scalar
                pl.BlockSpec(memory_space=pltpu.MemorySpace.SMEM),
                # labels: SMEM vector, read per batch row
                pl.BlockSpec(memory_space=pltpu.MemorySpace.SMEM),
            ],
            out_specs=(
                pl.BlockSpec((B, 1), lambda b, k: (0, 0)),
                pl.BlockSpec((1, 1), lambda b, k: (0, 0)),
            ),
            scratch_shapes=[
                pltpu.VMEM((1, H), jnp.float32),   # masked-sum accumulator
                pltpu.VMEM((1, 1), jnp.float32),   # mask-sum accumulator
                pltpu.VMEM((1, 1), jnp.float32),   # loss accumulator
            ],
        ),
        compiler_params=pltpu.CompilerParams(
            # Batch axis stays "arbitrary": the scalar loss reduction carries
            # scratch state across batch rows (no megacore split of the batch).
            dimension_semantics=("arbitrary", "arbitrary"),
            vmem_limit_bytes=32 * 1024 * 1024,
        ),
    )(emb, mask3,
      params["enc_w"].astype(jnp.bfloat16), params["enc_b"],
      params["lin_w"], params["lin_b"], labels1d)

    return loss[0, 0], logits


# -----------------------------------------------------------------------------
# Pure-JAX reference (same bf16 cast in the synthetic encoder, f32 head math)
# -----------------------------------------------------------------------------
def reference_forward(params, input_ids, attention_mask, labels):
    B, S = input_ids.shape
    emb = jnp.take(params["emb"], input_ids, axis=0)
    xb = emb.astype(jnp.bfloat16)
    wb = params["enc_w"].astype(jnp.bfloat16)
    hidden = jnp.tanh(
        jnp.einsum("bsh,hd->bsd", xb, wb, preferred_element_type=jnp.float32)
        + params["enc_b"])                                   # [B,S,H] f32
    m = attention_mask.astype(jnp.float32)[:, :, None]
    pooled = jnp.sum(hidden * m, axis=1) / jnp.sum(m, axis=1)
    z = (jnp.sum(pooled * params["lin_w"], axis=-1, keepdims=True)
         + params["lin_b"][0, 0])
    y = labels.reshape(B, 1).astype(jnp.float32)
    loss = jnp.mean(jnp.maximum(z, 0.0) - z * y + jnp.log1p(jnp.exp(-jnp.abs(z))))
    return loss, z


if __name__ == "__main__":
    B, S, H, V = 2, 8, 32, 64

    key = jax.random.PRNGKey(0)
    k_emb, k_encw, k_encb, k_linw, k_ids, k_lbl = jax.random.split(key, 6)

    params = {
        "emb":   jax.random.normal(k_emb,  (V, H), jnp.float32) * 0.02,
        "enc_w": jax.random.normal(k_encw, (H, H), jnp.float32) * 0.1,
        "enc_b": jax.random.normal(k_encb, (1, H), jnp.float32) * 0.1,
        # nn.Linear(hidden_size, 1): weight [1, H] (torch layout), bias [1, 1]
        "lin_w": jax.random.normal(k_linw, (1, H), jnp.float32) * 0.1,
        "lin_b": jnp.zeros((1, 1), jnp.float32),
    }

    input_ids = jax.random.randint(k_ids, (B, S), 0, V, dtype=jnp.int32)
    # variable-length attention masks (lengths 6 and 8)
    lengths = jnp.array([6, 8], dtype=jnp.int32)
    attention_mask = (jnp.arange(S)[None, :] < lengths[:, None]).astype(jnp.int32)
    labels = jax.random.bernoulli(k_lbl, 0.5, (B,)).astype(jnp.float32)

    loss, logits = concat_bert_forward(params, input_ids, attention_mask, labels)
    jax.block_until_ready((loss, logits))

    ref_loss, ref_logits = reference_forward(params, input_ids, attention_mask, labels)
    assert jnp.allclose(logits, ref_logits, atol=1e-4, rtol=1e-4), (logits, ref_logits)
    assert jnp.allclose(loss, ref_loss, atol=1e-4, rtol=1e-4), (loss, ref_loss)

    print("KERNEL_OK")
</pallas_src>

<mosaic_0001>
module attributes {stable_mosaic.version = 11 : i64} {
  func.func @_fused_kernel(%arg0: i32, %arg1: i32, %arg2: memref<1x8x32xbf16, #tpu.memory_space<vmem>>, %arg3: memref<1x8x1xf32, #tpu.memory_space<vmem>>, %arg4: memref<32x32xbf16, #tpu.memory_space<vmem>>, %arg5: memref<1x32xf32, #tpu.memory_space<vmem>>, %arg6: memref<1x32xf32, #tpu.memory_space<vmem>>, %arg7: memref<1x1xf32, #tpu.memory_space<smem>>, %arg8: memref<2xf32, #tpu.memory_space<smem>>, %arg9: memref<2x1xf32, #tpu.memory_space<vmem>>, %arg10: memref<1x1xf32, #tpu.memory_space<vmem>>, %arg11: memref<1x32xf32, #tpu.memory_space<vmem>>, %arg12: memref<1x1xf32, #tpu.memory_space<vmem>>, %arg13: memref<1x1xf32, #tpu.memory_space<vmem>>) attributes {dimension_semantics = [#tpu.dimension_semantics<arbitrary>, #tpu.dimension_semantics<arbitrary>], iteration_bounds = array<i64: 2, 1>, scalar_prefetch = 0 : i64, scratch_operands = 3 : i64, tpu.core_type = #tpu.core_type<tc>, window_params = [{transform_indices = @transform_0, window_bounds = array<i64: 1, 8, 32>}, {transform_indices = @transform_1, window_bounds = array<i64: 1, 8, 1>}, {pipeline_mode = #tpu.pipeline_mode<synchronous>, transform_indices = @transform_2, window_bounds = array<i64: 32, 32>}, {pipeline_mode = #tpu.pipeline_mode<synchronous>, transform_indices = @transform_3, window_bounds = array<i64: 1, 32>}, {pipeline_mode = #tpu.pipeline_mode<synchronous>, transform_indices = @transform_4, window_bounds = array<i64: 1, 32>}, {transform_indices = @transform_5, window_bounds = array<i64: 1, 1>}, {transform_indices = @transform_6, window_bounds = array<i64: 2>}, {pipeline_mode = #tpu.pipeline_mode<synchronous>, transform_indices = @transform_7, window_bounds = array<i64: 2, 1>}, {pipeline_mode = #tpu.pipeline_mode<synchronous>, transform_indices = @transform_8, window_bounds = array<i64: 1, 1>}]} {
    %c0_i32 = arith.constant 0 : i32
    %0 = arith.cmpi eq, %arg0, %c0_i32 : i32
    %c0_i32_0 = arith.constant 0 : i32
    %1 = arith.cmpi eq, %arg1, %c0_i32_0 : i32
    %2 = arith.andi %0, %1 : i1
    %3 = arith.extui %2 : i1 to i32
    %c0_i32_1 = arith.constant 0 : i32
    %4 = arith.cmpi ne, %3, %c0_i32_1 : i32
    scf.if %4 {
      %cst_27 = arith.constant 0.000000e+00 : f32
      %38 = vector.broadcast %cst_27 : f32 to vector<1x1xf32>
      %c0_28 = arith.constant 0 : index
      %c0_29 = arith.constant 0 : index
      %39 = vector.load %arg13[%c0_28, %c0_29] : memref<1x1xf32, #tpu.memory_space<vmem>>, vector<1x1xf32>
      tpu.vector_store %arg13[%c0_28, %c0_29], %38 {strides = array<i32>} : memref<1x1xf32, #tpu.memory_space<vmem>>, vector<1x1xf32>,
    } else {
    }
    %c0_i32_2 = arith.constant 0 : i32
    %5 = arith.cmpi eq, %arg1, %c0_i32_2 : i32
    %6 = arith.extui %5 : i1 to i32
    %c0_i32_3 = arith.constant 0 : i32
    %7 = arith.cmpi ne, %6, %c0_i32_3 : i32
    scf.if %7 {
      %cst_27 = arith.constant 0.000000e+00 : f32
      %38 = vector.broadcast %cst_27 : f32 to vector<1x32xf32>
      %c0_28 = arith.constant 0 : index
      %c0_29 = arith.constant 0 : index
      %39 = vector.load %arg11[%c0_28, %c0_29] : memref<1x32xf32, #tpu.memory_space<vmem>>, vector<1x32xf32>
      tpu.vector_store %arg11[%c0_28, %c0_29], %38 {strides = array<i32>} : memref<1x32xf32, #tpu.memory_space<vmem>>, vector<1x32xf32>,
      %cst_30 = arith.constant 0.000000e+00 : f32
      %40 = vector.broadcast %cst_30 : f32 to vector<1x1xf32>
      %c0_31 = arith.constant 0 : index
      %c0_32 = arith.constant 0 : index
      %41 = vector.load %arg12[%c0_31, %c0_32] : memref<1x1xf32, #tpu.memory_space<vmem>>, vector<1x1xf32>
      tpu.vector_store %arg12[%c0_31, %c0_32], %40 {strides = array<i32>} : memref<1x1xf32, #tpu.memory_space<vmem>>, vector<1x1xf32>,
    } else {
    }
    %c0 = arith.constant 0 : index
    %c0_4 = arith.constant 0 : index
    %c0_5 = arith.constant 0 : index
    %8 = vector.load %arg2[%c0, %c0_4, %c0_5] : memref<1x8x32xbf16, #tpu.memory_space<vmem>>, vector<1x8x32xbf16>
    %9 = vector.shape_cast %8 : vector<1x8x32xbf16> to vector<8x32xbf16>
    %c0_6 = arith.constant 0 : index
    %c0_7 = arith.constant 0 : index
    %10 = vector.load %arg4[%c0_6, %c0_7] : memref<32x32xbf16, #tpu.memory_space<vmem>>, vector<32x32xbf16>
    %cst = arith.constant dense<0.000000e+00> : vector<8x32xf32>
    %11 = tpu.matmul %9, %10, %cst {dimension_numbers = #tpu.dot_dimension_numbers<[1], [0], [0], [1], [0, 0, 1, 1], [], []>} : vector<8x32xbf16>, vector<32x32xbf16>, vector<8x32xf32> -> vector<8x32xf32>
    %c0_8 = arith.constant 0 : index
    %c0_9 = arith.constant 0 : index
    %12 = vector.load %arg5[%c0_8, %c0_9] : memref<1x32xf32, #tpu.memory_space<vmem>>, vector<1x32xf32>
    %13 = vector.broadcast %12 : vector<1x32xf32> to vector<8x32xf32>
    %14 = arith.addf %11, %13 : vector<8x32xf32>
    %15 = math.tanh %14 : vector<8x32xf32>
    %c0_10 = arith.constant 0 : index
    %c0_11 = arith.constant 0 : index
    %c0_12 = arith.constant 0 : index
    %16 = vector.load %arg3[%c0_10, %c0_11, %c0_12] : memref<1x8x1xf32, #tpu.memory_space<vmem>>, vector<1x8x1xf32>
    %17 = vector.shape_cast %16 : vector<1x8x1xf32> to vector<8x1xf32>
    %c0_13 = arith.constant 0 : index
    %c0_14 = arith.constant 0 : index
    %18 = vector.load %arg11[%c0_13, %c0_14] : memref<1x32xf32, #tpu.memory_space<vmem>>, vector<1x32xf32>
    %19 = vector.broadcast %17 : vector<8x1xf32> to vector<8x32xf32>
    %20 = arith.mulf %15, %19 : vector<8x32xf32>
    %cst_15 = arith.constant dense<0.000000e+00> : vector<32xf32>
    %21 = vector.multi_reduction <add>, %20, %cst_15 [0] : vector<8x32xf32> to vector<32xf32>
    %22 = vector.shape_cast %21 : vector<32xf32> to vector<1x32xf32>
    %23 = arith.addf %18, %22 : vector<1x32xf32>
    %c0_16 = arith.constant 0 : index
    %c0_17 = arith.constant 0 : index
    %24 = vector.load %arg11[%c0_16, %c0_17] : memref<1x32xf32, #tpu.memory_space<vmem>>, vector<1x32xf32>
    tpu.vector_store %arg11[%c0_16, %c0_17], %23 {strides = array<i32>} : memref<1x32xf32, #tpu.memory_space<vmem>>, vector<1x32xf32>,
    %c0_18 = arith.constant 0 : index
    %c0_19 = arith.constant 0 : index
    %25 = vector.load %arg12[%c0_18, %c0_19] : memref<1x1xf32, #tpu.memory_space<vmem>>, vector<1x1xf32>
    %cst_20 = arith.constant dense<0.000000e+00> : vector<1xf32>
    %26 = vector.multi_reduction <add>, %17, %cst_20 [0] : vector<8x1xf32> to vector<1xf32>
    %27 = vector.shape_cast %26 : vector<1xf32> to vector<1x1xf32>
    %28 = arith.addf %25, %27 : vector<1x1xf32>
    %c0_21 = arith.constant 0 : index
    %c0_22 = arith.constant 0 : index
    %29 = vector.load %arg12[%c0_21, %c0_22] : memref<1x1xf32, #tpu.memory_space<vmem>>, vector<1x1xf32>
    tpu.vector_store %arg12[%c0_21, %c0_22], %28 {strides = array<i32>} : memref<1x1xf32, #tpu.memory_space<vmem>>, vector<1x1xf32>,
    %c0_i32_23 = arith.constant 0 : i32
    %30 = arith.cmpi eq, %arg1, %c0_i32_23 : i32
    %31 = arith.extui %30 : i1 to i32
    %c0_i32_24 = arith.constant 0 : i32
    %32 = arith.cmpi ne, %31, %c0_i32_24 : i32
    scf.if %32 {
      %c0_27 = arith.constant 0 : index
      %c0_28 = arith.constant 0 : index
      %38 = vector.load %arg11[%c0_27, %c0_28] : memref<1x32xf32, #tpu.memory_space<vmem>>, vector<1x32xf32>
      %c0_29 = arith.constant 0 : index
      %c0_30 = arith.constant 0 : index
      %39 = vector.load %arg12[%c0_29, %c0_30] : memref<1x1xf32, #tpu.memory_space<vmem>>, vector<1x1xf32>
      %40 = vector.broadcast %39 : vector<1x1xf32> to vector<1x32xf32>
      %41 = arith.divf %38, %40 : vector<1x32xf32>
      %c0_31 = arith.constant 0 : index
      %c0_32 = arith.constant 0 : index
      %42 = vector.load %arg6[%c0_31, %c0_32] : memref<1x32xf32, #tpu.memory_space<vmem>>, vector<1x32xf32>
      %43 = arith.mulf %41, %42 : vector<1x32xf32>
      %cst_33 = arith.constant dense<0.000000e+00> : vector<1xf32>
      %44 = vector.multi_reduction <add>, %43, %cst_33 [1] : vector<1x32xf32> to vector<1xf32>
      %45 = vector.shape_cast %44 : vector<1xf32> to vector<1x1xf32>
      %c0_34 = arith.constant 0 : index
      %c0_35 = arith.constant 0 : index
      %46 = memref.load %arg7[%c0_34, %c0_35] : memref<1x1xf32, #tpu.memory_space<smem>>
      %47 = vector.broadcast %46 : f32 to vector<1x1xf32>
      %48 = arith.addf %45, %47 : vector<1x1xf32>
      %49 = arith.index_cast %arg0 : i32 to index
      %c0_36 = arith.constant 0 : index
      %50 = vector.load %arg9[%49, %c0_36] : memref<2x1xf32, #tpu.memory_space<vmem>>, vector<1x1xf32>
      tpu.vector_store %arg9[%49, %c0_36], %48 {strides = array<i32>} : memref<2x1xf32, #tpu.memory_space<vmem>>, vector<1x1xf32>,
      %51 = arith.index_cast %arg0 : i32 to index
      %52 = memref.load %arg8[%51] : memref<2xf32, #tpu.memory_space<smem>>
      %c0_37 = arith.constant 0 : index
      %c0_38 = arith.constant 0 : index
      %53 = vector.load %arg13[%c0_37, %c0_38] : memref<1x1xf32, #tpu.memory_space<vmem>>, vector<1x1xf32>
      %cst_39 = arith.constant 0.000000e+00 : f32
      %54 = vector.broadcast %cst_39 : f32 to vector<1x1xf32>
      %55 = arith.maximumf %48, %54 : vector<1x1xf32>
      %56 = vector.broadcast %52 : f32 to vector<1x1xf32>
      %57 = arith.mulf %48, %56 : vector<1x1xf32>
      %58 = arith.subf %55, %57 : vector<1x1xf32>
      %59 = math.absf %48 : vector<1x1xf32>
      %cst_40 = arith.constant 0.000000e+00 : f32
      %60 = vector.broadcast %cst_40 : f32 to vector<1x1xf32>
      %61 = arith.subf %60, %59 : vector<1x1xf32>
      %62 = math.exp %61 : vector<1x1xf32>
      %63 = math.log1p %62 : vector<1x1xf32>
      %64 = arith.addf %58, %63 : vector<1x1xf32>
      %65 = arith.addf %53, %64 : vector<1x1xf32>
      %c0_41 = arith.constant 0 : index
      %c0_42 = arith.constant 0 : index
      %66 = vector.load %arg13[%c0_41, %c0_42] : memref<1x1xf32, #tpu.memory_space<vmem>>, vector<1x1xf32>
      tpu.vector_store %arg13[%c0_41, %c0_42], %65 {strides = array<i32>} : memref<1x1xf32, #tpu.memory_space<vmem>>, vector<1x1xf32>,
    } else {
    }
    %c1_i32 = arith.constant 1 : i32
    %33 = arith.cmpi eq, %arg0, %c1_i32 : i32
    %c0_i32_25 = arith.constant 0 : i32
    %34 = arith.cmpi eq, %arg1, %c0_i32_25 : i32
    %35 = arith.andi %33, %34 : i1
    %36 = arith.extui %35 : i1 to i32
    %c0_i32_26 = arith.constant 0 : i32
    %37 = arith.cmpi ne, %36, %c0_i32_26 : i32
    scf.if %37 {
      %c0_27 = arith.constant 0 : index
      %c0_28 = arith.constant 0 : index
      %38 = vector.load %arg13[%c0_27, %c0_28] : memref<1x1xf32, #tpu.memory_space<vmem>>, vector<1x1xf32>
      %cst_29 = arith.constant 2.000000e+00 : f32
      %39 = vector.broadcast %cst_29 : f32 to vector<1x1xf32>
      %40 = arith.divf %38, %39 : vector<1x1xf32>
      %c0_30 = arith.constant 0 : index
      %c0_31 = arith.constant 0 : index
      %41 = vector.load %arg10[%c0_30, %c0_31] : memref<1x1xf32, #tpu.memory_space<vmem>>, vector<1x1xf32>
      tpu.vector_store %arg10[%c0_30, %c0_31], %40 {strides = array<i32>} : memref<1x1xf32, #tpu.memory_space<vmem>>, vector<1x1xf32>,
    } else {
    }
    return
  }
  func.func @transform_0(%arg0: i32, %arg1: i32) -> (i32, i32, i32) {
    %c0_i32 = arith.constant 0 : i32
    %c0_i32_0 = arith.constant 0 : i32
    return %arg0, %arg1, %c0_i32 : i32, i32, i32
  }
  func.func @transform_1(%arg0: i32, %arg1: i32) -> (i32, i32, i32) {
    %c0_i32 = arith.constant 0 : i32
    %c0_i32_0 = arith.constant 0 : i32
    return %arg0, %arg1, %c0_i32 : i32, i32, i32
  }
  func.func @transform_2(%arg0: i32, %arg1: i32) -> (i32, i32) {
    %c0_i32 = arith.constant 0 : i32
    %c0_i32_0 = arith.constant 0 : i32
    %c0_i32_1 = arith.constant 0 : i32
    return %c0_i32, %c0_i32_0 : i32, i32
  }
  func.func @transform_3(%arg0: i32, %arg1: i32) -> (i32, i32) {
    %c0_i32 = arith.constant 0 : i32
    %c0_i32_0 = arith.constant 0 : i32
    %c0_i32_1 = arith.constant 0 : i32
    return %c0_i32, %c0_i32_0 : i32, i32
  }
  func.func @transform_4(%arg0: i32, %arg1: i32) -> (i32, i32) {
    %c0_i32 = arith.constant 0 : i32
    %c0_i32_0 = arith.constant 0 : i32
    %c0_i32_1 = arith.constant 0 : i32
    return %c0_i32, %c0_i32_0 : i32, i32
  }
  func.func @transform_5(%arg0: i32, %arg1: i32) -> (i32, i32) {
    %c0_i32 = arith.constant 0 : i32
    %c0_i32_0 = arith.constant 0 : i32
    %c0_i32_1 = arith.constant 0 : i32
    return %c0_i32, %c0_i32_0 : i32, i32
  }
  func.func @transform_6(%arg0: i32, %arg1: i32) -> i32 {
    %c0_i32 = arith.constant 0 : i32
    %c0_i32_0 = arith.constant 0 : i32
    return %c0_i32 : i32
  }
  func.func @transform_7(%arg0: i32, %arg1: i32) -> (i32, i32) {
    %c0_i32 = arith.constant 0 : i32
    %c0_i32_0 = arith.constant 0 : i32
    %c0_i32_1 = arith.constant 0 : i32
    return %c0_i32, %c0_i32_0 : i32, i32
  }
  func.func @transform_8(%arg0: i32, %arg1: i32) -> (i32, i32) {
    %c0_i32 = arith.constant 0 : i32
    %c0_i32_0 = arith.constant 0 : i32
    %c0_i32_1 = arith.constant 0 : i32
    return %c0_i32, %c0_i32_0 : i32, i32
  }
}

</mosaic_0001>

<bundles_post_ra>
// kernel: tpu_custom_call.1
= control target key start
LH: loop header
LB: loop body
LE: loop exit
PB: predicated region body
PF: predicated region fallthrough
CT: control target
= control target key end

     0   :  { %s952_s0 = inlined_call_operand.vmem [shape: bf16[2,8,32], index: 0, kind: input, shape index: {}]   ;;  %s953_s1 = inlined_call_operand.vmem [shape: f32[2,8,1], index: 1, kind: input, shape index: {}]   ;;  %s954_s2 = inlined_call_operand.vmem [shape: bf16[32,32], index: 2, kind: input, shape index: {}]   ;;  %s955_s3 = inlined_call_operand.vmem [shape: f32[1,32], index: 3, kind: input, shape index: {}]   ;;  %s956_s4 = inlined_call_operand.vmem [shape: f32[1,32], index: 4, kind: input, shape index: {}]   ;;  %s957_s5 = inlined_call_operand.<no memory space> [shape: f32[1,1], index: 5, kind: input, shape index: {}]   ;;  %s958_s6 = inlined_call_operand.vmem [shape: f32[2], index: 6, kind: input, shape index: {}]   ;;  %s959_s7 = inlined_call_operand.vmem [shape: f32[2,1], index: 7, kind: output, shape index: {0}]   ;;  %s960_s8 = inlined_call_operand.hbm [shape: f32[1,1], index: 8, kind: output, shape index: {1}]  }
   0x1   :  { %14 = sst [smem:[#allocation5]] %s957_s5 }
   0x2   :  { %15 = vsyncpa [#allocation8], 0 }
   0x3   :  { %16 = vsyncpa [#allocation7], 0  ;;  %s832_s29 = smov 0   ;;  %s834_s30 = smov 0  }
   0x4   :  { %s836_s9 = smov 0  }
   0x5 LB: > { %s617_s5 = sadd.s32 4294967295, %s776_s9   ;;  %s34_s10 = sadd.s32 1, %s772_s30  ;;  %s776_s9 = sphi %s836_s9, %s22_s9   ;;  %s772_s30 = sphi %s834_s30, %s965_s30   ;;  %s768_s29 = sphi %s832_s29, %s964_s29  }
   0x6   : > { %p36_p0 = scmp.ge.s32.totalorder %s34_s10, 2  ;;  %p618_p1 = scmp.ge.s32.totalorder %s776_s9, 1 }
   0x7   : > { %p242_p2 = scmp.lt.s32.totalorder %s776_s9, 3  ;;  %p859_p4 = scmp.eq.s32.totalorder %s617_s5, 0 }
   0x8   : > { %s967_s10 = smov (%p36_p0, %s34_s10), 0  ;;  %s267_s15 = sshll.u32 %s958_s6, 4  ;;  %s268_s15 = int_to_ptr.vmem [resolvable:$true] %s267_s15 }
   0x9   : > { %p853_p3 = pnand %p618_p1, %p242_p2  ;;  %s705_s16 = scalar_lea.vmem %s268_s15, 16 }
   0xa   : > { %p706_p7 = scmp.ne.s32.totalorder %s268_s15, %s705_s16  ;;  %p713_p11 = scmp.lt.s32.totalorder %s268_s15, %s268_s15 }
   0xb   : > { %p656_p5 = pneg %p853_p3  ;;  %p714_p12 = scmp.lt.s32.totalorder %s705_s16, %s705_s16 }
   0xd   : > { %p657_p6 = pnand %p859_p4, %p656_p5  ;;  %p715_p13 = por %p714_p12, %p713_p11 }
   0xf   : > { %p707_p8 = pneg %p657_p6 }
  0x11   : > { %p708_p9 = pnand %p707_p8, %p706_p7 }
  0x13   : > { %p709_p10 = pneg %p708_p9 }
  0x15   : > { %p716_p0 = pnand %p715_p13, %p709_p10 }
  0x17   : > { %719 = shalt.err (!%p716_p0)
}
  0x18   : > { %s778_s17 = smov [#allocation6]   ;;  %300 = sbr.rel (%p853_p3) target bundleno = 525 (0x20d), region = 48 }
  0x19   : > { %659 = dma.vmem_to_smem (!%p657_p6), %s268_s15, 16, %s778_s17, [#allocation8]  }
  0x1f   : > { %759 = dma.done.wait (%p859_p4), [#allocation8], 16  }
  0x20   : > { %761 = vsyncadd (%p859_p4), [#allocation8], 4294967280 }
  0x21   : > { %306 = sfence }
  0x22   : > { %p339_p1 = scmp.lt.s32.totalorder %s768_s29, 1  ;;  %p354_p2 = scmp.eq.s32.totalorder %s768_s29, 0 }
  0x23   : > { %vm360_vm0 = vcmask (%p354_p2), 0   ;;  %v779_v0 = vmov (%p354_p2), 0.0  }
  0x24   : > { %s340_s18 = scalar_select %p339_p1, %s768_s29, 1 }
  0x25   : > { %359 = sbr.rel (!%p354_p2) target bundleno = 44 (0x2c), region = 56  ;;  %361 = vst.msk [vmem:[#allocation4] sm:$0x1] (%p354_p2), %vm360_vm0, %v779_v0 }
  0x26   : > { %s623_s19 = sshll.u32 %s340_s18, 2  ;;  %s624_s20 = sshll.u32 %s340_s18, 3 }
  0x27   : > { %s345_s23 = scalar_lea.vmem %s952_s0, %s623_s19  ;;  %s352_s26 = scalar_lea.vmem %s953_s1, %s624_s20 }
  0x2c PF: > { %vm367_vm1 = vcmask 0   ;;  %v780_v1 = vmov 0.0   ;;  %v695_v2 = vld [vmem:[%s954_s2] sm:$0xff]   ;;  %vm781_vm2 = vmmov 0   ;;  %v696_v4 = vld [vmem:[%s954_s2 + $0x8] sm:$0xff]   ;;  %v782_v5 = vmov 0   ;;  %s492_s20 = scalar_lea.vmem %s959_s7, %s768_s29 }
  0x2d   : > { %368 = vst.msk [vmem:[#allocation3] sm:$0x1] %vm367_vm1, %v780_v1  ;;  %640 = vmatprep.subr.bf16.mxu0 %v780_v1  ;;  %644 = vmatprep.mubr.msk.bf16.mxu0 %vm781_vm2, %v780_v1  ;;  %v438_v3 = vld [vmem:[%s352_s26] sm:$0xff]  ;;  %vm457_vm3 = vcmask 7168   ;;  %vm393_vm4 = vcmask 261120   ;;  %vm365_vm5 = vcmask 253952   ;;  %v478_v23 = vlaneseq }
  0x2e   : > { %641 = vmatpush3.bf16.msra.mxu0 %v695_v2  ;;  %694 = vset.pattern.permute.xlu0 %v782_v5  ;;  %v458_v6 = vsel %vm457_vm3, %v438_v3, 0.0  ;;  %v369_v8 = vld [vmem:[%s345_s23] sm:$0xf]  ;;  %366 = vst.msk [vmem:[#allocation2] sm:$0x1] %vm365_vm5, %v780_v1  ;;  %p516_p3 = scmp.eq.s32.totalorder %s768_s29, 1 }
  0x2f   : > { %642 = vmatprep.subr.bf16.mxu0 %v780_v1  ;;  %442 = vperm.xlu0 %694, %v438_v3   ;;  %v459_v7 = vrot.slane %v458_v6, 4  ;;  %v626_v17 = vld [vmem:[%s955_s3] ss:$0 sm:$0xff]  ;;  %v479_v28 = vshrl.u32 %v478_v23, 7  ;;  %s489_s17 = sld [smem:[#allocation5]] }
  0x30   : > { %v484_v42 = vld [vmem:[%s956_s4] sm:$0x1]  ;;  %s494_s21 = sld [smem:[#allocation6 + %s768_s29]]  ;;  %v495_v0 = vld [vmem:[#allocation4] sm:$0x1] }
  0x31   : > { %v460_v9 = vadd.f32 %v459_v7, %v458_v6  ;;  %v480_v31 = vsub.s32 0, %v479_v28 }
  0x32   : > { %643 = vmatpush3.bf16.msra.mxu0 %v696_v4 }
  0x33   : > { %v461_v10 = vrot.slane %v460_v9, 2 }
  0x34   : > { %v456_v13 = vld [vmem:[#allocation3] sm:$0x1] }
  0x35   : > { %645 = vmatmul.mubr.msk.bf16.vlgmr.msra.gmra.mrb[0].mxu0 %vm393_vm4, %v369_v8  ;;  %v462_v11 = vadd.f32 %v461_v10, %v460_v9  ;;  %v439_v37 = vld [vmem:[#allocation2] sm:$0x1]  ;;  %v490_v46 = vstv %s489_s17 }
  0x36   : > { %v497_v55 = vstv %s494_s21 }
  0x37   : > { %v463_v12 = vrot.slane %v462_v11, 1 }
  0x39   : > { %v464_v14 = vadd.f32 %v463_v12, %v462_v11 }
  0x3b   : > { %v465_v15 = vadd.f32 %v464_v14, %v456_v13 }
  0x3d   : > { %467 = vst.msk [vmem:[#allocation3] sm:$0x1] %vm367_vm1, %v465_v15 }
  0x44   : > { %v472_v16 = vld [vmem:[#allocation3] sm:$0x1] }
  0x45   : > { %475 = vperm.xlu0 %694, %v472_v16  }
  0xae   : > { %v443_v25 = vpop.permute.xlu0 %442 }
  0xc4   : > { %v476_v33 = vpop.permute.xlu0 %475 }
  0xc5   : > { %v481_v35 = vrot.slane %v476_v33, %v480_v31 }
 0x108   : > { %v431_v18 = vpop.f32.mrb[0].mxu0 }
 0x109   : > { %v432_v19 = vadd.f32 %v626_v17, %v431_v18  ;;  %v646_v20 = vpop.f32.mrb[1].mxu0 }
 0x10a   : > { %v434_v21 = vpop.f32.mrb[2].mxu0 }
 0x10b   : > { %697 = vtanh.f32 %v432_v19  ;;  %v647_v22 = vpop.f32.mrb[3].mxu0 }
 0x10c   : > { %699 = vrcp.f32 %v481_v35 }
 0x115   : > { %v698_v24 = vpop.eup %697 }
 0x116   : > { %v445_v26 = vmul.f32 %v698_v24, %v443_v25  ;;  %v700_v40 = vpop.eup %699 }
 0x118   : > { %v446_v27 = vsel %vm393_vm4, %v445_v26, 0.0 }
 0x119   : > { %v447_v29 = vrot.slane %v446_v27, 4 }
 0x11b   : > { %v448_v30 = vadd.f32 %v447_v29, %v446_v27 }
 0x11d   : > { %v449_v32 = vrot.slane %v448_v30, 2 }
 0x11f   : > { %v450_v34 = vadd.f32 %v449_v32, %v448_v30 }
 0x121   : > { %v451_v36 = vrot.slane %v450_v34, 1 }
 0x123   : > { %v452_v38 = vadd.f32 %v451_v36, %v450_v34 }
 0x125   : > { %v453_v39 = vadd.f32 %v452_v38, %v439_v37 }
 0x127   : > { %455 = vst.msk [vmem:[#allocation2] sm:$0x1] %vm365_vm5, %v453_v39 }
 0x12e   : > { %v471_v41 = vld [vmem:[#allocation2] sm:$0x1] }
 0x12f   : > { %v483_v43 = vmul.f32 %v700_v40, %v471_v41 }
 0x131   : > { %v485_v44 = vmul.f32 %v484_v42, %v483_v43 }
 0x133   : > { %v486_v45 = vsel %vm365_vm5, %v485_v44, 0.0 }
 0x134   : > { %487 = vadd.xlane.f32.xlu1 %v486_v45 }
 0x1c1   : > { %v488_v47 = vpop.xlane.xlu1 %487 }
 0x1c2   : > { %v491_v48 = vadd.f32 %v490_v46, %v488_v47 }
 0x1c4   : > { %493 = vst.msk [vmem:[%s492_s20] sm:$0x1] %vm367_vm1, %v491_v48  ;;  %v500_v49 = vand.u32 2147483647, %v491_v48  ;;  %v496_v57 = vmax.f32 %v491_v48, 0.0  ;;  %v498_v58 = vmul.f32 %v497_v55, %v491_v48 }
 0x1c6   : > { %v501_v50 = vsub.f32 0.0, %v500_v49  ;;  %v499_v63 = vsub.f32 %v496_v57, %v498_v58 }
 0x1c8   : > { %v502_v51 = vmul.f32 1.442695, %v501_v50 }
 0x1ca   : > { %701 = vpow2.f32 %v502_v51 }
 0x1d4   : > { %v702_v52 = vpop.eup %701 }
 0x1d5   : > { %v504_v53 = vadd.f32 1.0, %v702_v52  ;;  %v507_v54 = vmul.f32 -0.5, %v702_v52  ;;  %v510_v59 = vand.u32 2147483647, %v702_v52 }
 0x1d7   : > { %703 = vlog2.f32 %v504_v53  ;;  %v508_v56 = vadd.f32 1.0, %v507_v54  ;;  %vm511_vm6 = vcmp.lt.f32.partialorder %v510_v59, 0.0004427343 }
 0x1d9   : > { %v509_v62 = vmul.f32 %v702_v52, %v508_v56 }
 0x1e1   : > { %v704_v60 = vpop.eup %703 }
 0x1e2   : > { %v506_v61 = vmul.f32 0.6931472, %v704_v60 }
 0x1e3   : > { %520 = sbr.rel (!%p516_p3) target bundleno = 500 (0x1f4), region = 68 }
 0x1e4   : > { %v512_v1 = vsel %vm511_vm6, %v509_v62, %v506_v61 }
 0x1e5   : > { %v513_v2 = vadd.f32 %v512_v1, %v499_v63 }
 0x1e7   : > { %v514_v3 = vadd.f32 %v513_v2, %v495_v0 }
 0x1e9   : > { %515 = vst.msk [vmem:[#allocation4] sm:$0x1] %vm367_vm1, %v514_v3 }
 0x1f0   : > { %v521_v4 = vld [vmem:[#allocation4] sm:$0x1] }
 0x1f1   : > { %v523_v5 = vmul.f32 0.5, %v521_v4 }
 0x1f3   : > { %524 = vst.msk [vmem:[#allocation9] sm:$0x1] %vm367_vm1, %v523_v5 }
 0x1f4 PF: > { %p917_p4 = scmp.eq.s32.totalorder %s617_s5, 1  ;;  %s783_s23 = smov [#allocation9]  }
 0x1f5   : > { %s535_s24 = sshll.u32 %s783_s23, 4  ;;  %s536_s24 = int_to_ptr.vmem [resolvable:$true] %s535_s24 }
 0x1f6   : > { %s720_s25 = scalar_lea.vmem %s536_s24, 16  ;;  %s726_s29 = scalar_lea.vmem %s536_s24, 32 }
 0x1f7   : > { %p721_p5 = scmp.ne.s32.totalorder %s536_s24, %s720_s25  ;;  %p727_p8 = scmp.lt.s32.totalorder %s536_s24, %s536_s24 }
 0x1f8   : > { %p728_p9 = scmp.lt.s32.totalorder %s726_s29, %s720_s25 }
 0x1f9   : > { %p722_p6 = pnand %p721_p5, %p917_p4 }
 0x1fa   : > { %p729_p10 = por %p728_p9, %p727_p8 }
 0x1fb   : > { %p723_p7 = pneg %p722_p6 }
 0x1fd   : > { %p730_p11 = pnand %p729_p10, %p723_p7 }
 0x1ff   : > { %733 = shalt.err (!%p730_p11)
}
 0x200   : > { %s734_s27 = scalar_lea.hbm %s960_s8, 16 }
 0x201   : > { %p735_p12 = scmp.ne.s32.totalorder %s960_s8, %s734_s27  ;;  %p740_p1 = scmp.lt.u32.totalorder %s734_s27, %s960_s8 }
 0x203   : > { %p736_p13 = pnand %p735_p12, %p917_p4 }
 0x205   : > { %p737_p0 = pneg %p736_p13 }
 0x207   : > { %p742_p2 = pnand %p740_p1, %p737_p0 }
 0x209   : > { %745 = shalt.err (!%p742_p2)
}
 0x20a   : > { %653 = dma.vmem_to_hbm [thread:$0]  (%p917_p4), %s536_s24, 16, %s960_s8, [#allocation7]  }
 0x20b   : > { %763 = dma.done.wait (%p917_p4), [#allocation7], 16  }
 0x20c   : > { %765 = vsyncadd (%p917_p4), [#allocation7], 4294967280 }
 0x20d PF: > { %s22_s9 = sadd.s32 1, %s776_s9   ;;  %s964_s29 = smov %s772_s30 }
 0x20e   : > { %p19_p3 = scmp.ge.s32.totalorder %s22_s9, 4   ;;  %s965_s30 = smov %s967_s10 }
 0x210   :  { %21 = sbr.rel (!%p19_p3) target bundleno = 5 (0x5), region = 108 }
 0x217   :  { %551 = vsyncpa [#allocation7], 1 }
 0x218   :  { %553 = vsyncpa [#allocation7 + $0x1], 1 }
 0x219   :  { %554 = vsyncpa [#allocation8], 1 }
 0x21a   :  { %556 = vsyncpa [#allocation8 + $0x1], 1 }

</bundles_post_ra>
